<compile_context>
chip_gen: v5e
topology: v5e:2x2
jax: 0.10.0
libtpu: 0.0.40
codegen_flags: <defaults>
</compile_context>

<pallas_src>
import jax
import jax.numpy as jnp
from jax.experimental import pallas as pl
from jax.experimental.pallas import tpu as pltpu


def affine_kernel(p_ref, x_ref, o_ref):
    # p_ref: (2, Dw)  row 0 = alpha, row 1 = beta
    # x_ref / o_ref: (tr, Dw)
    alpha = p_ref[0:1, :]                       # (1, Dw) -> broadcast over rows
    beta = p_ref[1:2, :]                        # (1, Dw)
    o_ref[...] = x_ref[...] * alpha + beta      # addcmul(beta, alpha, x)


def affine(x, alpha, beta, *, vmem_budget_bytes=8 * 1024 * 1024):
    """x: (B, S, D). alpha/beta: broadcastable to (1, 1, D) (as in the module)."""
    B, S, D = x.shape
    R = B * S

    # Lane-dense repack: group G rows per super-row so the last dim is a full
    # 128-lane width when the channel dim is small.
    G = 1
    if D < 128 and (128 % D == 0) and (R % (128 // D) == 0):
        G = 128 // D
    Rw, Dw = R // G, D * G

    x2 = x.reshape(Rw, Dw)

    # Fuse the two tiny (1,1,D) params into one (2, Dw) input: one DMA, one
    # VMEM tile, no per-step re-fetch (constant index_map keeps it resident).
    a = jnp.reshape(alpha, (1, D)).astype(x.dtype)
    b = jnp.reshape(beta, (1, D)).astype(x.dtype)
    params = jnp.concatenate([a, b], axis=0)
    if G > 1:
        params = jnp.tile(params, (1, G))       # (2, Dw), repeats match repack

    # Row tile: biggest 8-aligned tile whose double-buffered in+out copies fit
    # the VMEM budget (bigger tiles ~= closer to the HBM roofline).
    bytes_per_row = Dw * jnp.dtype(x.dtype).itemsize
    max_rows = max(8, vmem_budget_bytes // (4 * bytes_per_row))
    if Rw <= max_rows:
        tr = Rw                                 # full extent (always legal)
    else:
        tr = (max_rows // 8) * 8                # 8-aligned sublane tile
    grid = (pl.cdiv(Rw, tr),)

    out = pl.pallas_call(
        affine_kernel,
        out_shape=jax.ShapeDtypeStruct((Rw, Dw), x.dtype),
        grid_spec=pltpu.PrefetchScalarGridSpec(
            num_scalar_prefetch=0,
            grid=grid,
            in_specs=[
                pl.BlockSpec((2, Dw), lambda i: (0, 0)),   # fused alpha/beta
                pl.BlockSpec((tr, Dw), lambda i: (i, 0)),  # x rows
            ],
            out_specs=pl.BlockSpec((tr, Dw), lambda i: (i, 0)),
        ),
        compiler_params=pltpu.CompilerParams(
            dimension_semantics=("parallel",)),
    )(params, x2)
    return out.reshape(B, S, D)


def affine_ref(x, alpha, beta):
    # Mirrors torch.addcmul(beta, alpha, x) = beta + alpha * x
    return beta + alpha * x


if __name__ == "__main__":
    B, S, D = 2, 8, 32  # batch, seq, hidden — small shapes consistent with the module
    key = jax.random.PRNGKey(0)
    kx, ka, kb = jax.random.split(key, 3)

    x = jax.random.normal(kx, (B, S, D), jnp.float32)
    # Module initializes alpha=ones, beta=zeros; use random values here so the
    # correctness check exercises both the scale and the shift.
    alpha = jax.random.normal(ka, (1, 1, D), jnp.float32)
    beta = jax.random.normal(kb, (1, 1, D), jnp.float32)

    out = affine(x, alpha, beta)
    out = jax.block_until_ready(out)

    ref = affine_ref(x, alpha, beta)
    assert out.shape == (B, S, D)
    assert jnp.allclose(out, ref, atol=1e-6, rtol=1e-6), "mismatch vs reference"
    print("KERNEL_OK")
</pallas_src>

<mosaic_0001>
module attributes {stable_mosaic.version = 11 : i64} {
  func.func @affine_kernel(%arg0: i32, %arg1: memref<2x128xf32, #tpu.memory_space<vmem>>, %arg2: memref<4x128xf32, #tpu.memory_space<vmem>>, %arg3: memref<4x128xf32, #tpu.memory_space<vmem>>) attributes {dimension_semantics = [#tpu.dimension_semantics<parallel>], iteration_bounds = array<i64: 1>, scalar_prefetch = 0 : i64, scratch_operands = 0 : i64, tpu.core_type = #tpu.core_type<tc>, window_params = [{pipeline_mode = #tpu.pipeline_mode<synchronous>, transform_indices = @transform_0, window_bounds = array<i64: 2, 128>}, {transform_indices = @transform_1, window_bounds = array<i64: 4, 128>}, {transform_indices = @transform_2, window_bounds = array<i64: 4, 128>}]} {
    %c0 = arith.constant 0 : index
    %c0_0 = arith.constant 0 : index
    %0 = vector.load %arg1[%c0, %c0_0] : memref<2x128xf32, #tpu.memory_space<vmem>>, vector<1x128xf32>
    %c1 = arith.constant 1 : index
    %c0_1 = arith.constant 0 : index
    %1 = vector.load %arg1[%c1, %c0_1] : memref<2x128xf32, #tpu.memory_space<vmem>>, vector<1x128xf32>
    %c0_2 = arith.constant 0 : index
    %c0_3 = arith.constant 0 : index
    %2 = vector.load %arg2[%c0_2, %c0_3] : memref<4x128xf32, #tpu.memory_space<vmem>>, vector<4x128xf32>
    %3 = vector.broadcast %0 : vector<1x128xf32> to vector<4x128xf32>
    %4 = arith.mulf %2, %3 : vector<4x128xf32>
    %5 = vector.broadcast %1 : vector<1x128xf32> to vector<4x128xf32>
    %6 = arith.addf %4, %5 : vector<4x128xf32>
    %c0_4 = arith.constant 0 : index
    %c0_5 = arith.constant 0 : index
    %7 = vector.load %arg3[%c0_4, %c0_5] : memref<4x128xf32, #tpu.memory_space<vmem>>, vector<4x128xf32>
    tpu.vector_store %arg3[%c0_4, %c0_5], %6 {strides = array<i32>} : memref<4x128xf32, #tpu.memory_space<vmem>>, vector<4x128xf32>,
    return
  }
  func.func @transform_0(%arg0: i32) -> (i32, i32) {
    %c0_i32 = arith.constant 0 : i32
    %c0_i32_0 = arith.constant 0 : i32
    %c0_i32_1 = arith.constant 0 : i32
    return %c0_i32, %c0_i32_0 : i32, i32
  }
  func.func @transform_1(%arg0: i32) -> (i32, i32) {
    %c0_i32 = arith.constant 0 : i32
    %c0_i32_0 = arith.constant 0 : i32
    return %arg0, %c0_i32 : i32, i32
  }
  func.func @transform_2(%arg0: i32) -> (i32, i32) {
    %c0_i32 = arith.constant 0 : i32
    %c0_i32_0 = arith.constant 0 : i32
    return %arg0, %c0_i32 : i32, i32
  }
}

</mosaic_0001>

<bundles_post_ra>
// kernel: tpu_custom_call.1
= control target key start
LH: loop header
LB: loop body
LE: loop exit
PB: predicated region body
PF: predicated region fallthrough
CT: control target
= control target key end

     0   :  { %7 = vsyncpa [#allocation3], 0  ;;  %s176_s0 = inlined_call_operand.hbm [shape: f32[2,128], index: 0, kind: input, shape index: {}]   ;;  %s177_s1 = inlined_call_operand.hbm [shape: f32[4,128], index: 1, kind: input, shape index: {}]   ;;  %s178_s2 = inlined_call_operand.hbm [shape: f32[4,128], index: 2, kind: output, shape index: {}]  }
   0x1   :  { %8 = vsyncpa [#allocation6], 0 }
   0x2   :  { %9 = vsyncpa [#allocation4], 0  ;;  %s15_s11 = sshll.u32 %s176_s0, 4  ;;  %s149_s12 = smov [#allocation2]   ;;  %s16_s11 = int_to_ptr.hbm [resolvable:$true] %s15_s11 }
   0x3   :  { %s17_s13 = sshll.u32 %s149_s12, 4  ;;  %s26_s16 = sshll.u32 %s177_s1, 4  ;;  %s18_s13 = int_to_ptr.vmem [resolvable:$true] %s17_s13  ;;  %s27_s16 = int_to_ptr.hbm [resolvable:$true] %s26_s16 }
   0x4   :  { %20 = dma.hbm_to_vmem [thread:$0]  %s16_s11, 32, %s18_s13, [#allocation3]  }
   0x5   :  { %s150_s17 = smov [#allocation5]  }
   0x6   :  { %s28_s18 = sshll.u32 %s150_s17, 4  ;;  %s29_s18 = int_to_ptr.vmem [resolvable:$true] %s28_s18 }
   0x7   :  { %31 = dma.hbm_to_vmem [thread:$0]  %s27_s16, 64, %s29_s18, [#allocation6]  }
   0x8   :  { %143 = dma.done.wait [#allocation3], 32  }
   0x9   :  { %144 = vsyncadd [#allocation3], 4294967264 }
   0xa   :  { %145 = dma.done.wait [#allocation6], 64  }
   0xb   :  { %146 = vsyncadd [#allocation6], 4294967232  ;;  %v42_v0 = vld [vmem:[#allocation5] sm:$0xf]  ;;  %v69_v1 = vld [vmem:[#allocation2] ss:$0 sm:$0xff] }
   0xc   :  { %v70_v2 = vld [vmem:[#allocation2 + $0x1] ss:$0 sm:$0xff]  ;;  %s151_s0 = smov [#allocation7]   ;;  %s55_s22 = sshll.u32 %s178_s2, 4  ;;  %v44_v3 = vmul.f32 %v69_v1, %v42_v0  ;;  %s56_s22 = int_to_ptr.hbm [resolvable:$true] %s55_s22 }
   0xd   :  { %s53_s19 = sshll.u32 %s151_s0, 4  ;;  %s54_s19 = int_to_ptr.vmem [resolvable:$true] %s53_s19 }
   0xe   :  { %v46_v4 = vadd.f32 %v70_v2, %v44_v3 }
  0x10   :  { %47 = vst [vmem:[#allocation7] sm:$0xf] %v46_v4 }
  0x11   :  { %58 = dma.vmem_to_hbm [thread:$0]  %s54_s19, 64, %s56_s22, [#allocation4]  }
  0x12   :  { %147 = dma.done.wait [#allocation4], 64  }
  0x13   :  { %148 = vsyncadd [#allocation4], 4294967232 }
  0x14   :  { %63 = vsyncpa [#allocation3], 1 }
  0x15   :  { %64 = vsyncpa [#allocation6], 1 }
  0x16   :  { %65 = vsyncpa [#allocation4], 1 }

</bundles_post_ra>
